<compile_context>
chip_gen: v7x
topology: tpu7x:2x2x1
jax: 0.10.0
libtpu: 0.0.40
codegen_flags: <defaults>
</compile_context>

<pallas_src>
import functools

import jax
import jax.numpy as jnp
from jax.experimental import pallas as pl
from jax.experimental.pallas import tpu as pltpu


def _round_up(x, m):
    return (x + m - 1) // m * m


def _ce_ls_kernel(x_ref, lbl_ref, o_ref, *, n_valid, epsilon, num_classes,
                  block_rows):
    """One row-block: writes this block's partial loss sum to o_ref[0, 0]."""
    i = pl.program_id(0)

    x = x_ref[...].astype(jnp.float32)                        # (tb, K) f32
    lbl = lbl_ref[...]                                         # (tb, 1) int32
    tb, K = x.shape

    # numerically stable logsumexp per row
    m = jnp.max(x, axis=1, keepdims=True)                      # (tb, 1)
    lse = m + jnp.log(jnp.sum(jnp.exp(x - m), axis=1, keepdims=True))

    # fused smoothing term:  sum_c [eps/K + (1-eps)*1{c==label}] * x_c
    # (1, K) iota broadcast against the (tb, 1) labels -> no (tb, K) iota temp
    col = jax.lax.broadcasted_iota(jnp.int32, (1, K), 1)
    uni = epsilon / num_classes
    w = jnp.where(col == lbl, uni + (1.0 - epsilon), uni)      # (tb, K)
    tgt = jnp.sum(w * x, axis=1, keepdims=True)                # (tb, 1)

    row_loss = lse - tgt                                        # (tb, 1)

    # drop rows past the true batch (pad-to-8 rows and the out-of-bounds part
    # of a partial tail block); where() selects, so garbage/Inf/NaN from those
    # rows never reaches the reduction.
    row = i * block_rows + jax.lax.broadcasted_iota(jnp.int32, (tb, 1), 0)
    row_loss = jnp.where(row < n_valid, row_loss, 0.0)

    o_ref[0, 0] = jnp.sum(row_loss)                             # partial sum


def _choose_block_rows(batch_padded, K, in_bytes, *, target_dma_bytes=4 << 20,
                       max_rows=2048):
    # aim for ~2-4 MiB of logits DMA per grid step (tile-size sweet spot)
    tb = (target_dma_bytes // max(K * in_bytes, 1)) // 8 * 8
    tb = max(8, min(tb, max_rows, batch_padded))
    return int(tb)


def cross_entropy_label_smooth(inputs, targets, num_classes, epsilon=0.1,
                               block_rows=None):
    """Pallas implementation of CrossEntropyLabelSmooth.forward(inputs, targets).

    inputs:  (B, num_classes) logits (any float dtype; cast to f32 in-kernel)
    targets: (B,) integer class labels, assumed to lie in [0, num_classes)
    """
    B, K = inputs.shape
    assert K == num_classes
    in_bytes = jnp.dtype(inputs.dtype).itemsize

    # pad the batch only to a multiple of 8 (sublane alignment); NO pad-to-tb
    Bp = _round_up(B, 8)
    if Bp != B:
        inputs = jnp.pad(inputs, ((0, Bp - B), (0, 0)))
        targets = jnp.pad(targets, (0, Bp - B))
    labels = targets.astype(jnp.int32).reshape(Bp, 1)

    tb = block_rows if block_rows is not None else _choose_block_rows(Bp, K, in_bytes)
    tb = min(_round_up(int(tb), 8), Bp)
    num_blocks = pl.cdiv(Bp, tb)

    # per-step VMEM working set: double-buffered input block + f32 cast temp
    working = tb * K * (2 * in_bytes + 4)
    vmem_limit = int(min(max(2 * working + (2 << 20), 16 << 20), 48 << 20))

    kernel = functools.partial(
        _ce_ls_kernel,
        n_valid=B,
        epsilon=float(epsilon),
        num_classes=int(num_classes),
        block_rows=tb,
    )

    # TODO(synk): for vocab-scale K (tb*K f32 no longer fitting VMEM) add a
    # second grid axis over K with an online logsumexp / running weighted sum.
    partial_sums = pl.pallas_call(
        kernel,
        out_shape=jax.ShapeDtypeStruct((num_blocks, 1), jnp.float32),
        grid=(num_blocks,),
        in_specs=[
            pl.BlockSpec((tb, K), lambda i: (i, 0)),    # logits row-block (VMEM)
            pl.BlockSpec((tb, 1), lambda i: (i, 0)),    # labels column (VMEM)
        ],
        out_specs=pl.BlockSpec((1, 1), lambda i: (i, 0),
                               memory_space=pltpu.MemorySpace.SMEM),
        compiler_params=pltpu.CompilerParams(
            dimension_semantics=("parallel",),           # independent row-blocks
            vmem_limit_bytes=vmem_limit,
        ),
        cost_estimate=pl.CostEstimate(
            flops=8 * Bp * K,
            transcendentals=Bp * K,
            bytes_accessed=Bp * K * in_bytes + Bp * 4 + num_blocks * 4,
        ),
    )(inputs, labels)

    # tiny final reduction + the .mean(0).sum() normalization in the wrapper
    return jnp.sum(partial_sums) / float(B)


def _ref_loss(logits, targets, num_classes, epsilon):
    # pure-JAX reference mirroring the PyTorch module
    lp = jax.nn.log_softmax(logits.astype(jnp.float32), axis=1)
    onehot = jax.nn.one_hot(targets, num_classes, dtype=jnp.float32)
    t = (1.0 - epsilon) * onehot + epsilon / num_classes
    return jnp.sum(jnp.mean(-t * lp, axis=0))


if __name__ == "__main__":
    key = jax.random.PRNGKey(0)
    epsilon = 0.1
    k1, k2, k3, k4 = jax.random.split(key, 4)

    # case 1: small batch -> exercises pad-to-8 + single row-block
    B1, K1 = 12, 37
    logits1 = jax.random.normal(k1, (B1, K1), dtype=jnp.float32)
    targets1 = jax.random.randint(k2, (B1,), 0, K1, dtype=jnp.int32)
    loss1 = cross_entropy_label_smooth(logits1, targets1, K1, epsilon)
    jax.block_until_ready(loss1)
    ref1 = _ref_loss(logits1, targets1, K1, epsilon)
    assert jnp.allclose(loss1, ref1, atol=1e-5, rtol=1e-5), (loss1, ref1)

    # case 2: multi-block parallel grid with a partial (masked) tail block
    B2, K2 = 50, 37
    logits2 = jax.random.normal(k3, (B2, K2), dtype=jnp.float32)
    targets2 = jax.random.randint(k4, (B2,), 0, K2, dtype=jnp.int32)
    loss2 = cross_entropy_label_smooth(logits2, targets2, K2, epsilon,
                                       block_rows=16)
    jax.block_until_ready(loss2)
    ref2 = _ref_loss(logits2, targets2, K2, epsilon)
    assert jnp.allclose(loss2, ref2, atol=1e-5, rtol=1e-5), (loss2, ref2)

    print("KERNEL_OK")
</pallas_src>

<mosaic_0001>
module attributes {stable_mosaic.version = 11 : i64} {
  func.func @_ce_ls_kernel(%arg0: i32, %arg1: memref<16x37xf32, #tpu.memory_space<vmem>>, %arg2: memref<16x1xi32, #tpu.memory_space<vmem>>, %arg3: memref<1x1xf32, #tpu.memory_space<smem>>) attributes {dimension_semantics = [#tpu.dimension_semantics<parallel>], iteration_bounds = array<i64: 1>, scalar_prefetch = 0 : i64, scratch_operands = 0 : i64, tpu.core_type = #tpu.core_type<tc>, window_params = [{transform_indices = @transform_0, window_bounds = array<i64: 16, 37>}, {transform_indices = @transform_1, window_bounds = array<i64: 16, 1>}, {transform_indices = @transform_2, window_bounds = array<i64: 1, 1>}]} {
    %c0 = arith.constant 0 : index
    %c0_0 = arith.constant 0 : index
    %0 = vector.load %arg1[%c0, %c0_0] : memref<16x37xf32, #tpu.memory_space<vmem>>, vector<16x37xf32>
    %c0_1 = arith.constant 0 : index
    %c0_2 = arith.constant 0 : index
    %1 = vector.load %arg2[%c0_1, %c0_2] : memref<16x1xi32, #tpu.memory_space<vmem>>, vector<16x1xi32>
    %cst = arith.constant dense<0xFF800000> : vector<16xf32>
    %2 = vector.multi_reduction <maximumf>, %0, %cst [1] : vector<16x37xf32> to vector<16xf32>
    %3 = vector.shape_cast %2 : vector<16xf32> to vector<16x1xf32>
    %4 = vector.broadcast %3 : vector<16x1xf32> to vector<16x37xf32>
    %5 = arith.subf %0, %4 : vector<16x37xf32>
    %6 = math.exp %5 : vector<16x37xf32>
    %cst_3 = arith.constant dense<0.000000e+00> : vector<16xf32>
    %7 = vector.multi_reduction <add>, %6, %cst_3 [1] : vector<16x37xf32> to vector<16xf32>
    %8 = vector.shape_cast %7 : vector<16xf32> to vector<16x1xf32>
    %9 = math.log %8 : vector<16x1xf32>
    %10 = arith.addf %3, %9 : vector<16x1xf32>
    %11 = tpu.iota {dimensions = array<i32: 1>} : vector<1x37xi32>
    %12 = vector.broadcast %11 : vector<1x37xi32> to vector<16x37xi32>
    %13 = vector.broadcast %1 : vector<16x1xi32> to vector<16x37xi32>
    %14 = arith.cmpi eq, %12, %13 : vector<16x37xi32>
    %cst_4 = arith.constant 0.902702689 : f32
    %cst_5 = arith.constant 0.00270270277 : f32
    %15 = vector.broadcast %cst_4 : f32 to vector<16x37xf32>
    %16 = vector.broadcast %cst_5 : f32 to vector<16x37xf32>
    %17 = arith.select %14, %15, %16 : vector<16x37xi1>, vector<16x37xf32>
    %18 = arith.mulf %17, %0 : vector<16x37xf32>
    %cst_6 = arith.constant dense<0.000000e+00> : vector<16xf32>
    %19 = vector.multi_reduction <add>, %18, %cst_6 [1] : vector<16x37xf32> to vector<16xf32>
    %20 = vector.shape_cast %19 : vector<16xf32> to vector<16x1xf32>
    %21 = arith.subf %10, %20 : vector<16x1xf32>
    %c16_i32 = arith.constant 16 : i32
    %22 = arith.muli %arg0, %c16_i32 : i32
    %23 = tpu.iota {dimensions = array<i32: 0>} : vector<16x1xi32>
    %24 = vector.broadcast %22 : i32 to vector<16x1xi32>
    %25 = arith.addi %24, %23 : vector<16x1xi32>
    %c12_i32 = arith.constant 12 : i32
    %26 = vector.broadcast %c12_i32 : i32 to vector<16x1xi32>
    %27 = arith.cmpi slt, %25, %26 : vector<16x1xi32>
    %cst_7 = arith.constant 0.000000e+00 : f32
    %28 = vector.broadcast %cst_7 : f32 to vector<16x1xf32>
    %29 = arith.select %27, %21, %28 : vector<16x1xi1>, vector<16x1xf32>
    %30 = vector.shape_cast %29 : vector<16x1xf32> to vector<1x16x1xf32>
    %cst_8 = arith.constant dense<0.000000e+00> : vector<1xf32>
    %31 = vector.multi_reduction <add>, %30, %cst_8 [1, 2] : vector<1x16x1xf32> to vector<1xf32>
    %32 = vector.shape_cast %31 : vector<1xf32> to vector<1x1x1xf32>
    %33 = vector.extract %32[0, 0, 0] : f32 from vector<1x1x1xf32>
    %c0_9 = arith.constant 0 : index
    %c0_10 = arith.constant 0 : index
    %34 = memref.load %arg3[%c0_9, %c0_10] : memref<1x1xf32, #tpu.memory_space<smem>>
    memref.store %33, %arg3[%c0_9, %c0_10] : memref<1x1xf32, #tpu.memory_space<smem>>
    return
  }
  func.func @transform_0(%arg0: i32) -> (i32, i32) {
    %c0_i32 = arith.constant 0 : i32
    %c0_i32_0 = arith.constant 0 : i32
    return %arg0, %c0_i32 : i32, i32
  }
  func.func @transform_1(%arg0: i32) -> (i32, i32) {
    %c0_i32 = arith.constant 0 : i32
    %c0_i32_0 = arith.constant 0 : i32
    return %arg0, %c0_i32 : i32, i32
  }
  func.func @transform_2(%arg0: i32) -> (i32, i32) {
    %c0_i32 = arith.constant 0 : i32
    %c0_i32_0 = arith.constant 0 : i32
    return %arg0, %c0_i32 : i32, i32
  }
}

</mosaic_0001>

<bundles_post_ra>
// kernel: tpu_custom_call.1
= control target key start
LH: loop header
LB: loop body
LE: loop exit
PB: predicated region body
PF: predicated region fallthrough
CT: control target
= control target key end

     0   :  { %vm16_vm0 = vcmask 302080   ;;  %v129_v4 = vmov 0   ;;  %s177_s0 = inlined_call_operand.vmem [shape: f32[16,37], index: 0, kind: input, shape index: {}]   ;;  %s178_s1 = inlined_call_operand.vmem [shape: s32[16,1], index: 1, kind: input, shape index: {}]   ;;  %s179_s2 = inlined_call_operand.hbm [shape: f32[1,1], index: 2, kind: output, shape index: {}]  }
   0x1   :  { %v13_v0 = vld [vmem:[%s177_s0 + $0x8] sm:$0xff]  ;;  %v12_v1 = vld [vmem:[%s177_s0] sm:$0xff]  ;;  %107 = vset.pattern.permute.xlu1 %v129_v4  ;;  %108 = vset.pattern.permute.xlu0 %v129_v4 }
   0x2   :  { %v15_v2 = vld [vmem:[%s178_s1 + $0x8] sm:$0xff]  ;;  %v20_v3 = vsel %vm16_vm0, %v13_v0, -inf }
   0x3   :  { %7 = vsyncpa [#allocation3], 0  ;;  %21 = vmax.xlane.f32.xlu0 %v20_v3  ;;  %47 = vperm.xlu1 %107, %v15_v2   ;;  %v17_v5 = vsel %vm16_vm0, %v12_v1, -inf  ;;  %v14_v6 = vld [vmem:[%s178_s1] sm:$0xff]  ;;  %v41_v8 = vlaneseq  ;;  %v130_v17 = vmov 0.0027027028  }
   0x4   :  { %vm74_vm4 = vcmask 7168   ;;  %s117_s18 = scalar_lea.hbm %s179_s2, 16 }
   0x5   :  { %v42_v13 = vand.u32 127, %v41_v8  ;;  %v65_v30 = vshrl.u32 %v41_v8, 7  ;;  %p118_p0 = scmp.ne.s32.totalorder %s179_s2, %s117_s18  ;;  %p121_p1 = scmp.lt.u32.totalorder %s117_s18, %s179_s2 }
   0x7   :  { %18 = vmax.xlane.f32.xlu0 %v17_v5  ;;  %44 = vperm.xlu1 %107, %v14_v6   ;;  %v66_v33 = vadd.s32 8, %v65_v30  ;;  %p123_p2 = pnand %p121_p1, %p118_p0 }
   0x9   :  { %vm71_vm3 = vcmp.lt.s32.totalorder %v66_v33, 12 }
  0x82   :  { %v48_v11 = vpop.permute.xlu1 %47 }
  0x83   :  { %vm50_vm1 = vcmp.eq.s32.totalorder %v42_v13, %v48_v11 }
  0x84   :  { %v52_v18 = vsel %vm50_vm1, 0.9027027, %v130_v17 }
  0x85   :  { %v54_v19 = vmul.f32 %v52_v18, %v13_v0 }
  0x86   :  { %v45_v16 = vpop.permute.xlu1 %44 }
  0x87   :  { %vm49_vm2 = vcmp.eq.s32.totalorder %v42_v13, %v45_v16  ;;  %v58_v23 = vsel %vm16_vm0, %v54_v19, 0.0 }
  0x88   :  { %v51_v21 = vsel %vm49_vm2, 0.9027027, %v130_v17 }
  0x89   :  { %v53_v24 = vmul.f32 %v51_v21, %v12_v1 }
  0x8b   :  { %v55_v27 = vsel %vm16_vm0, %v53_v24, 0.0 }
  0x90   :  { %v22_v7 = vpop.xlane.xlu0 %21 }
  0x91   :  { %v24_v9 = vsub.f32 %v13_v0, %v22_v7 }
  0x93   :  { %v27_v10 = vmul.f32 1.442695, %v24_v9 }
  0x94   :  { %v19_v12 = vpop.xlane.xlu0 %18 }
  0x95   :  { %109 = vpow2.f32 %v27_v10  ;;  %v23_v14 = vsub.f32 %v12_v1, %v19_v12 }
  0x97   :  { %v25_v15 = vmul.f32 1.442695, %v23_v14 }
  0x99   :  { %111 = vpow2.f32 %v25_v15 }
  0x9f   :  { %v110_v20 = vpop.eup %109 }
  0xa0   :  { %v32_v22 = vsel %vm16_vm0, %v110_v20, 0.0 }
  0xa1   :  { %33 = vadd.xlane.f32.xlu0 %v32_v22 }
  0xa3   :  { %v112_v25 = vpop.eup %111 }
  0xa4   :  { %v29_v26 = vsel %vm16_vm0, %v112_v25, 0.0 }
  0xa5   :  { %30 = vadd.xlane.f32.xlu1 %v29_v26  ;;  %59 = vadd.xlane.f32.xlu0 %v58_v23 }
  0xa9   :  { %56 = vadd.xlane.f32.xlu0 %v55_v27 }
 0x12e   :  { %v34_v28 = vpop.xlane.xlu0 %33 }
 0x12f   :  { %113 = vlog2.f32 %v34_v28 }
 0x132   :  { %v31_v29 = vpop.xlane.xlu1 %30  ;;  %v60_v34 = vpop.xlane.xlu0 %59 }
 0x133   :  { %115 = vlog2.f32 %v31_v29 }
 0x136   :  { %v57_v41 = vpop.xlane.xlu0 %56 }
 0x139   :  { %v114_v31 = vpop.eup %113 }
 0x13a   :  { %v38_v32 = vmul.f32 0.6931472, %v114_v31 }
 0x13c   :  { %v40_v35 = vadd.f32 %v38_v32, %v22_v7 }
 0x13d   :  { %v116_v36 = vpop.eup %115 }
 0x13e   :  { %v36_v37 = vmul.f32 0.6931472, %v116_v36  ;;  %v62_v38 = vsub.f32 %v40_v35, %v60_v34 }
 0x140   :  { %v39_v39 = vadd.f32 %v36_v37, %v19_v12  ;;  %v73_v40 = vsel %vm71_vm3, %v62_v38, 0.0 }
 0x141   :  { %v76_v44 = vsel %vm74_vm4, %v73_v40, 0.0 }
 0x142   :  { %v61_v42 = vsub.f32 %v39_v39, %v57_v41 }
 0x144   :  { %v75_v43 = vsel %vm74_vm4, %v61_v42, 0.0 }
 0x145   :  { %v77_v45 = vadd.f32 %v76_v44, %v75_v43 }
 0x147   :  { %78 = vadd.xlane.f32.xlu0 %v77_v45 }
 0x1d4   :  { %v79_v46 = vpop.xlane.xlu0 %78 }
 0x1d5   :  { %v80_v47 = vrot.slane %v79_v46, 4 }
 0x1d7   :  { %v81_v48 = vadd.f32 %v80_v47, %v79_v46 }
 0x1d9   :  { %v82_v49 = vrot.slane %v81_v48, 2 }
 0x1db   :  { %v83_v50 = vadd.f32 %v82_v49, %v81_v48 }
 0x1dd   :  { %v84_v51 = vrot.slane %v83_v50, 1 }
 0x1df   :  { %v85_v52 = vadd.f32 %v84_v51, %v83_v50 }
 0x1e1   :  { %102 = vpush %v85_v52 }
 0x212   :  { %s103_s0 = spop %102 }
 0x213   :  { %88 = sst [smem:[#allocation2]] %s103_s0 }
 0x214   :  { %126 = shalt.err (!%p123_p2)
}
 0x215   :  { %s131_s23 = smov [#allocation2]  }
 0x216   :  { %96 = dma.smem_to_hbm %s131_s23, 16, %s179_s2, [#allocation3]  }
 0x217   :  { %127 = dma.done.wait [#allocation3], 16  }
 0x218   :  { %128 = vsyncadd [#allocation3], 4294967280 }
 0x219   :  { %100 = sfence }
 0x21a   :  { %101 = vsyncpa [#allocation3], 1 }

</bundles_post_ra>
